<compile_context>
chip_gen: v6e
topology: v6e:2x2x1
jax: 0.10.0
libtpu: 0.0.40
codegen_flags: <defaults>
</compile_context>

<pallas_src>
import jax
import jax.numpy as jnp
from jax.experimental import pallas as pl
from jax.experimental.pallas import tpu as pltpu

HIDDEN_SIZE = 128


def _round_up(n, m):
    return ((n + m - 1) // m) * m


def _cdiv(a, b):
    return (a + b - 1) // b


def _actor_kernel(x_ref,
                  w1_ref, b1_ref,
                  w2_ref, b2_ref,
                  w3_ref, b3_ref,
                  w4_ref, b4_ref,
                  ar_ref,
                  o_ref):
    """Fused 4-layer MLP: 3x (bf16 matmul + f32 bias + ReLU), then bf16 matmul + bias + tanh*range."""
    x = x_ref[...]                                   # f32 (tile, S)

    # Weights are already bf16; cast activations to bf16 right before each dot,
    # accumulate in f32 on the MXU.
    h = jnp.dot(x.astype(jnp.bfloat16), w1_ref[...],
                preferred_element_type=jnp.float32) + b1_ref[...]
    h = jnp.maximum(h, 0.0)

    h = jnp.dot(h.astype(jnp.bfloat16), w2_ref[...],
                preferred_element_type=jnp.float32) + b2_ref[...]
    h = jnp.maximum(h, 0.0)

    h = jnp.dot(h.astype(jnp.bfloat16), w3_ref[...],
                preferred_element_type=jnp.float32) + b3_ref[...]
    h = jnp.maximum(h, 0.0)

    out = jnp.dot(h.astype(jnp.bfloat16), w4_ref[...],
                  preferred_element_type=jnp.float32) + b4_ref[...]
    out = jnp.tanh(out) * ar_ref[...]                # tanh -> EUP, scale -> VPU
    o_ref[...] = out.astype(o_ref.dtype)


def _select_tiling(B, tile_b):
    """Balanced batch tiling: minimize padding, keep >=2 even steps for large B (v7x megacore)."""
    n = max(1, _cdiv(B, tile_b))
    if B > 512:
        # v7x has 2 TensorCores; "parallel" only helps with >=2 grid steps.
        n = max(2, n)
        if n % 2:
            n += 1
    tile = _round_up(_cdiv(B, n), 8)
    b_pad = n * tile
    return tile, b_pad, n


def actor_forward(state, params, action_range, *, tile_b=2048):
    """state: (B, S) float32. Returns (B, output_size) float32 actions."""
    w1, b1, w2, b2, w3, b3, w4, b4 = params
    B, S = state.shape
    H = w1.shape[1]
    O = w4.shape[1]
    ar = jnp.asarray(action_range, jnp.float32).reshape(1, O)

    # Weights cast to bf16 once here; they stay VMEM-resident across grid steps.
    w1b = w1.astype(jnp.bfloat16)
    w2b = w2.astype(jnp.bfloat16)
    w3b = w3.astype(jnp.bfloat16)
    w4b = w4.astype(jnp.bfloat16)

    tile, b_pad, n_steps = _select_tiling(B, tile_b)
    if b_pad != B:
        state = jnp.pad(state, ((0, b_pad - B), (0, 0)))
    grid = (n_steps,)

    tiled = lambda feat: pl.BlockSpec((tile, feat), lambda i: (i, 0))
    resident = lambda a: pl.BlockSpec(a.shape, lambda i: (0,) * a.ndim)

    # Advisory cost estimate for the XLA scheduler.
    flops = 2 * b_pad * (S * H + 2 * H * H + H * O)
    weight_bytes = 2 * (S * H + 2 * H * H + H * O) + 4 * (3 * H + O) + 4 * O
    bytes_accessed = 4 * b_pad * (S + O) + weight_bytes
    cost = pl.CostEstimate(flops=flops,
                           transcendentals=b_pad * O,
                           bytes_accessed=bytes_accessed)

    out_padded = pl.pallas_call(
        _actor_kernel,
        out_shape=jax.ShapeDtypeStruct((b_pad, O), jnp.float32),
        grid=grid,
        in_specs=[tiled(S),
                  resident(w1b), resident(b1),
                  resident(w2b), resident(b2),
                  resident(w3b), resident(b3),
                  resident(w4b), resident(b4),
                  resident(ar)],
        out_specs=tiled(O),
        compiler_params=pltpu.CompilerParams(
            dimension_semantics=("parallel",)),
        cost_estimate=cost,
    )(state, w1b, b1, w2b, b2, w3b, b3, w4b, b4, ar)

    return out_padded[:B]


def init_actor_params(key, input_size, hidden_size, output_size):
    """Deterministic init mimicking nn.Linear shapes (stored transposed as [in, out])."""
    def linear(k, fan_in, fan_out):
        kw, kb = jax.random.split(k)
        bound = 1.0 / jnp.sqrt(fan_in)
        w = jax.random.uniform(kw, (fan_in, fan_out), jnp.float32, -bound, bound)
        b = jax.random.uniform(kb, (1, fan_out), jnp.float32, -bound, bound)
        return w, b

    k1, k2, k3, k4 = jax.random.split(key, 4)
    w1, b1 = linear(k1, input_size, hidden_size)
    w2, b2 = linear(k2, hidden_size, hidden_size)
    w3, b3 = linear(k3, hidden_size, hidden_size)
    w4, b4 = linear(k4, hidden_size, output_size)
    return (w1, b1, w2, b2, w3, b3, w4, b4)


def actor_reference(state, params, action_range):
    """Pure-JAX f32 reference for correctness check."""
    w1, b1, w2, b2, w3, b3, w4, b4 = params
    ar = jnp.asarray(action_range, jnp.float32).reshape(1, -1)
    x = jnp.maximum(state @ w1 + b1, 0.0)
    x = jnp.maximum(x @ w2 + b2, 0.0)
    x = jnp.maximum(x @ w3 + b3, 0.0)
    return jnp.tanh(x @ w4 + b4) * ar


if __name__ == "__main__":
    key = jax.random.PRNGKey(0)
    k_params, k_state, k_state2 = jax.random.split(key, 3)

    batch = 4
    state_size = 8
    output_size = 2                      # matches len(action_range) in the torch module
    action_range = (2.0, 1.0)

    params = init_actor_params(k_params, state_size, HIDDEN_SIZE, output_size)

    # Small-batch path (single grid step).
    state = jax.random.normal(k_state, (batch, state_size), jnp.float32)
    out = actor_forward(state, params, action_range)
    out = jax.block_until_ready(out)
    ref = actor_reference(state, params, action_range)
    assert out.shape == (batch, output_size)
    # bf16 matmul operands (f32 accumulation) -> loosened tolerance vs f32 reference.
    assert jnp.allclose(out, ref, atol=2e-2, rtol=2e-2), "mismatch vs reference (small batch)"

    # Larger, non-multiple batch exercises balanced tiling + even >=2-step grid.
    batch2 = 600
    state2 = jax.random.normal(k_state2, (batch2, state_size), jnp.float32)
    out2 = jax.block_until_ready(actor_forward(state2, params, action_range))
    ref2 = actor_reference(state2, params, action_range)
    assert out2.shape == (batch2, output_size)
    assert jnp.allclose(out2, ref2, atol=2e-2, rtol=2e-2), "mismatch vs reference (large batch)"

    print("KERNEL_OK")
</pallas_src>

<mosaic_0001>
module attributes {stable_mosaic.version = 11 : i64} {
  func.func @_actor_kernel(%arg0: i32, %arg1: memref<8x8xf32, #tpu.memory_space<vmem>>, %arg2: memref<8x128xbf16, #tpu.memory_space<vmem>>, %arg3: memref<1x128xf32, #tpu.memory_space<vmem>>, %arg4: memref<128x128xbf16, #tpu.memory_space<vmem>>, %arg5: memref<1x128xf32, #tpu.memory_space<vmem>>, %arg6: memref<128x128xbf16, #tpu.memory_space<vmem>>, %arg7: memref<1x128xf32, #tpu.memory_space<vmem>>, %arg8: memref<128x2xbf16, #tpu.memory_space<vmem>>, %arg9: memref<1x2xf32, #tpu.memory_space<vmem>>, %arg10: memref<1x2xf32, #tpu.memory_space<vmem>>, %arg11: memref<8x2xf32, #tpu.memory_space<vmem>>) attributes {dimension_semantics = [#tpu.dimension_semantics<parallel>], iteration_bounds = array<i64: 1>, scalar_prefetch = 0 : i64, scratch_operands = 0 : i64, tpu.core_type = #tpu.core_type<tc>, window_params = [{transform_indices = @transform_0, window_bounds = array<i64: 8, 8>}, {pipeline_mode = #tpu.pipeline_mode<synchronous>, transform_indices = @transform_1, window_bounds = array<i64: 8, 128>}, {pipeline_mode = #tpu.pipeline_mode<synchronous>, transform_indices = @transform_2, window_bounds = array<i64: 1, 128>}, {pipeline_mode = #tpu.pipeline_mode<synchronous>, transform_indices = @transform_3, window_bounds = array<i64: 128, 128>}, {pipeline_mode = #tpu.pipeline_mode<synchronous>, transform_indices = @transform_4, window_bounds = array<i64: 1, 128>}, {pipeline_mode = #tpu.pipeline_mode<synchronous>, transform_indices = @transform_5, window_bounds = array<i64: 128, 128>}, {pipeline_mode = #tpu.pipeline_mode<synchronous>, transform_indices = @transform_6, window_bounds = array<i64: 1, 128>}, {pipeline_mode = #tpu.pipeline_mode<synchronous>, transform_indices = @transform_7, window_bounds = array<i64: 128, 2>}, {pipeline_mode = #tpu.pipeline_mode<synchronous>, transform_indices = @transform_8, window_bounds = array<i64: 1, 2>}, {pipeline_mode = #tpu.pipeline_mode<synchronous>, transform_indices = @transform_9, window_bounds = array<i64: 1, 2>}, {transform_indices = @transform_10, window_bounds = array<i64: 8, 2>}]} {
    %c0 = arith.constant 0 : index
    %c0_0 = arith.constant 0 : index
    %0 = vector.load %arg1[%c0, %c0_0] : memref<8x8xf32, #tpu.memory_space<vmem>>, vector<8x8xf32>
    %1 = arith.truncf %0 : vector<8x8xf32> to vector<8x8xbf16>
    %c0_1 = arith.constant 0 : index
    %c0_2 = arith.constant 0 : index
    %2 = vector.load %arg2[%c0_1, %c0_2] : memref<8x128xbf16, #tpu.memory_space<vmem>>, vector<8x128xbf16>
    %cst = arith.constant dense<0.000000e+00> : vector<8x128xf32>
    %3 = tpu.matmul %1, %2, %cst {dimension_numbers = #tpu.dot_dimension_numbers<[1], [0], [0], [1], [0, 0, 1, 1], [], []>} : vector<8x8xbf16>, vector<8x128xbf16>, vector<8x128xf32> -> vector<8x128xf32>
    %c0_3 = arith.constant 0 : index
    %c0_4 = arith.constant 0 : index
    %4 = vector.load %arg3[%c0_3, %c0_4] : memref<1x128xf32, #tpu.memory_space<vmem>>, vector<1x128xf32>
    %5 = vector.broadcast %4 : vector<1x128xf32> to vector<8x128xf32>
    %6 = arith.addf %3, %5 : vector<8x128xf32>
    %cst_5 = arith.constant 0.000000e+00 : f32
    %7 = vector.broadcast %cst_5 : f32 to vector<8x128xf32>
    %8 = arith.maximumf %6, %7 : vector<8x128xf32>
    %9 = arith.truncf %8 : vector<8x128xf32> to vector<8x128xbf16>
    %c0_6 = arith.constant 0 : index
    %c0_7 = arith.constant 0 : index
    %10 = vector.load %arg4[%c0_6, %c0_7] : memref<128x128xbf16, #tpu.memory_space<vmem>>, vector<128x128xbf16>
    %cst_8 = arith.constant dense<0.000000e+00> : vector<8x128xf32>
    %11 = tpu.matmul %9, %10, %cst_8 {dimension_numbers = #tpu.dot_dimension_numbers<[1], [0], [0], [1], [0, 0, 1, 1], [], []>} : vector<8x128xbf16>, vector<128x128xbf16>, vector<8x128xf32> -> vector<8x128xf32>
    %c0_9 = arith.constant 0 : index
    %c0_10 = arith.constant 0 : index
    %12 = vector.load %arg5[%c0_9, %c0_10] : memref<1x128xf32, #tpu.memory_space<vmem>>, vector<1x128xf32>
    %13 = vector.broadcast %12 : vector<1x128xf32> to vector<8x128xf32>
    %14 = arith.addf %11, %13 : vector<8x128xf32>
    %cst_11 = arith.constant 0.000000e+00 : f32
    %15 = vector.broadcast %cst_11 : f32 to vector<8x128xf32>
    %16 = arith.maximumf %14, %15 : vector<8x128xf32>
    %17 = arith.truncf %16 : vector<8x128xf32> to vector<8x128xbf16>
    %c0_12 = arith.constant 0 : index
    %c0_13 = arith.constant 0 : index
    %18 = vector.load %arg6[%c0_12, %c0_13] : memref<128x128xbf16, #tpu.memory_space<vmem>>, vector<128x128xbf16>
    %cst_14 = arith.constant dense<0.000000e+00> : vector<8x128xf32>
    %19 = tpu.matmul %17, %18, %cst_14 {dimension_numbers = #tpu.dot_dimension_numbers<[1], [0], [0], [1], [0, 0, 1, 1], [], []>} : vector<8x128xbf16>, vector<128x128xbf16>, vector<8x128xf32> -> vector<8x128xf32>
    %c0_15 = arith.constant 0 : index
    %c0_16 = arith.constant 0 : index
    %20 = vector.load %arg7[%c0_15, %c0_16] : memref<1x128xf32, #tpu.memory_space<vmem>>, vector<1x128xf32>
    %21 = vector.broadcast %20 : vector<1x128xf32> to vector<8x128xf32>
    %22 = arith.addf %19, %21 : vector<8x128xf32>
    %cst_17 = arith.constant 0.000000e+00 : f32
    %23 = vector.broadcast %cst_17 : f32 to vector<8x128xf32>
    %24 = arith.maximumf %22, %23 : vector<8x128xf32>
    %25 = arith.truncf %24 : vector<8x128xf32> to vector<8x128xbf16>
    %c0_18 = arith.constant 0 : index
    %c0_19 = arith.constant 0 : index
    %26 = vector.load %arg8[%c0_18, %c0_19] : memref<128x2xbf16, #tpu.memory_space<vmem>>, vector<128x2xbf16>
    %cst_20 = arith.constant dense<0.000000e+00> : vector<8x2xf32>
    %27 = tpu.matmul %25, %26, %cst_20 {dimension_numbers = #tpu.dot_dimension_numbers<[1], [0], [0], [1], [0, 0, 1, 1], [], []>} : vector<8x128xbf16>, vector<128x2xbf16>, vector<8x2xf32> -> vector<8x2xf32>
    %c0_21 = arith.constant 0 : index
    %c0_22 = arith.constant 0 : index
    %28 = vector.load %arg9[%c0_21, %c0_22] : memref<1x2xf32, #tpu.memory_space<vmem>>, vector<1x2xf32>
    %29 = vector.broadcast %28 : vector<1x2xf32> to vector<8x2xf32>
    %30 = arith.addf %27, %29 : vector<8x2xf32>
    %31 = math.tanh %30 : vector<8x2xf32>
    %c0_23 = arith.constant 0 : index
    %c0_24 = arith.constant 0 : index
    %32 = vector.load %arg10[%c0_23, %c0_24] : memref<1x2xf32, #tpu.memory_space<vmem>>, vector<1x2xf32>
    %33 = vector.broadcast %32 : vector<1x2xf32> to vector<8x2xf32>
    %34 = arith.mulf %31, %33 : vector<8x2xf32>
    %c0_25 = arith.constant 0 : index
    %c0_26 = arith.constant 0 : index
    %35 = vector.load %arg11[%c0_25, %c0_26] : memref<8x2xf32, #tpu.memory_space<vmem>>, vector<8x2xf32>
    tpu.vector_store %arg11[%c0_25, %c0_26], %34 {strides = array<i32>} : memref<8x2xf32, #tpu.memory_space<vmem>>, vector<8x2xf32>,
    return
  }
  func.func @transform_0(%arg0: i32) -> (i32, i32) {
    %c0_i32 = arith.constant 0 : i32
    %c0_i32_0 = arith.constant 0 : i32
    return %arg0, %c0_i32 : i32, i32
  }
  func.func @transform_1(%arg0: i32) -> (i32, i32) {
    %c0_i32 = arith.constant 0 : i32
    %c0_i32_0 = arith.constant 0 : i32
    %c0_i32_1 = arith.constant 0 : i32
    return %c0_i32, %c0_i32_0 : i32, i32
  }
  func.func @transform_2(%arg0: i32) -> (i32, i32) {
    %c0_i32 = arith.constant 0 : i32
    %c0_i32_0 = arith.constant 0 : i32
    %c0_i32_1 = arith.constant 0 : i32
    return %c0_i32, %c0_i32_0 : i32, i32
  }
  func.func @transform_3(%arg0: i32) -> (i32, i32) {
    %c0_i32 = arith.constant 0 : i32
    %c0_i32_0 = arith.constant 0 : i32
    %c0_i32_1 = arith.constant 0 : i32
    return %c0_i32, %c0_i32_0 : i32, i32
  }
  func.func @transform_4(%arg0: i32) -> (i32, i32) {
    %c0_i32 = arith.constant 0 : i32
    %c0_i32_0 = arith.constant 0 : i32
    %c0_i32_1 = arith.constant 0 : i32
    return %c0_i32, %c0_i32_0 : i32, i32
  }
  func.func @transform_5(%arg0: i32) -> (i32, i32) {
    %c0_i32 = arith.constant 0 : i32
    %c0_i32_0 = arith.constant 0 : i32
    %c0_i32_1 = arith.constant 0 : i32
    return %c0_i32, %c0_i32_0 : i32, i32
  }
  func.func @transform_6(%arg0: i32) -> (i32, i32) {
    %c0_i32 = arith.constant 0 : i32
    %c0_i32_0 = arith.constant 0 : i32
    %c0_i32_1 = arith.constant 0 : i32
    return %c0_i32, %c0_i32_0 : i32, i32
  }
  func.func @transform_7(%arg0: i32) -> (i32, i32) {
    %c0_i32 = arith.constant 0 : i32
    %c0_i32_0 = arith.constant 0 : i32
    %c0_i32_1 = arith.constant 0 : i32
    return %c0_i32, %c0_i32_0 : i32, i32
  }
  func.func @transform_8(%arg0: i32) -> (i32, i32) {
    %c0_i32 = arith.constant 0 : i32
    %c0_i32_0 = arith.constant 0 : i32
    %c0_i32_1 = arith.constant 0 : i32
    return %c0_i32, %c0_i32_0 : i32, i32
  }
  func.func @transform_9(%arg0: i32) -> (i32, i32) {
    %c0_i32 = arith.constant 0 : i32
    %c0_i32_0 = arith.constant 0 : i32
    %c0_i32_1 = arith.constant 0 : i32
    return %c0_i32, %c0_i32_0 : i32, i32
  }
  func.func @transform_10(%arg0: i32) -> (i32, i32) {
    %c0_i32 = arith.constant 0 : i32
    %c0_i32_0 = arith.constant 0 : i32
    return %arg0, %c0_i32 : i32, i32
  }
}

</mosaic_0001>

<bundles_post_ra>
// kernel: tpu_custom_call.1
= control target key start
LH: loop header
LB: loop body
LE: loop exit
PB: predicated region body
PF: predicated region fallthrough
CT: control target
= control target key end

     0   :  { %15 = vsyncpa [#allocation3], 0  ;;  %s846_s0 = inlined_call_operand.hbm [shape: f32[8,8], index: 0, kind: input, shape index: {}]   ;;  %s847_s1 = inlined_call_operand.vmem [shape: bf16[8,128], index: 1, kind: input, shape index: {}]   ;;  %s848_s2 = inlined_call_operand.vmem [shape: f32[1,128], index: 2, kind: input, shape index: {}]   ;;  %s849_s3 = inlined_call_operand.vmem [shape: bf16[128,128], index: 3, kind: input, shape index: {}]   ;;  %s850_s4 = inlined_call_operand.vmem [shape: f32[1,128], index: 4, kind: input, shape index: {}]   ;;  %s851_s5 = inlined_call_operand.hbm [shape: bf16[128,128], index: 5, kind: input, shape index: {}]   ;;  %s852_s6 = inlined_call_operand.vmem [shape: f32[1,128], index: 6, kind: input, shape index: {}]   ;;  %s853_s7 = inlined_call_operand.vmem [shape: bf16[128,2], index: 7, kind: input, shape index: {}]   ;;  %s854_s8 = inlined_call_operand.vmem [shape: f32[1,2], index: 8, kind: input, shape index: {}]   ;;  %s855_s9 = inlined_call_operand.vmem [shape: f32[1,2], index: 9, kind: input, shape index: {}]   ;;  %s856_s10 = inlined_call_operand.vmem [shape: f32[8,2], index: 10, kind: output, shape index: {}]  }
   0x1   :  { %16 = vsyncpa [#allocation5], 0  ;;  %s677_s13 = smov [#allocation2]   ;;  %s678_s15 = smov [#allocation4]  }
   0x2   :  { %s23_s14 = sshll.u32 %s677_s13, 4  ;;  %s40_s16 = sshll.u32 %s678_s15, 4  ;;  %s24_s14 = int_to_ptr.vmem [resolvable:$true] %s23_s14  ;;  %s41_s16 = int_to_ptr.vmem [resolvable:$true] %s40_s16 }
   0x3   :  { %s641_s17 = scalar_lea.vmem %s24_s14, 128  ;;  %p646_p1 = scmp.lt.s32.totalorder %s24_s14, %s24_s14 }
   0x4   :  { %p642_p0 = scmp.ne.s32.totalorder %s24_s14, %s641_s17  ;;  %p647_p2 = scmp.lt.s32.totalorder %s641_s17, %s641_s17 }
   0x6   :  { %p648_p3 = por %p647_p2, %p646_p1 }
   0x8   :  { %p649_p4 = pnand %p648_p3, %p642_p0 }
   0xa   :  { %652 = shalt.err (!%p649_p4)
}
   0xb   :  { %26 = dma.hbm_to_vmem [thread:$0]  %s846_s0, 128, %s24_s14, [#allocation3]  }
   0xc   :  { %s661_s20 = scalar_lea.vmem %s41_s16, 1024  ;;  %p666_p6 = scmp.lt.s32.totalorder %s41_s16, %s41_s16 }
   0xd   :  { %p662_p5 = scmp.ne.s32.totalorder %s41_s16, %s661_s20  ;;  %p667_p7 = scmp.lt.s32.totalorder %s661_s20, %s661_s20 }
   0xf   :  { %p668_p8 = por %p667_p7, %p666_p6 }
  0x11   :  { %p669_p9 = pnand %p668_p8, %p662_p5 }
  0x13   :  { %672 = shalt.err (!%p669_p9)
}
  0x14   :  { %s679_s21 = smov 64   ;;  %s680_s22 = smov 4  }
  0x15   :  { %46 = dma.hbm_to_vmem [thread:$0]  %s851_s5, 1024, %s41_s16, [#allocation5], %s679_s21, %s679_s21, %s680_s22  }
  0x16   :  { %673 = dma.done.wait [#allocation3], 128  }
  0x17   :  { %674 = vsyncadd [#allocation3], 4294967168 }
  0x18   :  { %675 = dma.done.wait [#allocation5], 1024  }
  0x19   :  { %676 = vsyncadd [#allocation5], 4294966272  ;;  %v681_v0 = vmov 0.0   ;;  %vm682_vm0 = vmmov 0   ;;  %vm76_vm1 = vcmask 1043456   ;;  %v62_v2 = vld [vmem:[#allocation2] sm:$0xff] }
  0x1a   :  { %535 = vmatprep.subr.bf16.mxu0 %v681_v0  ;;  %537 = vmatprep.mubr.msk.bf16.mxu0 %vm682_vm0, %v681_v0  ;;  %v64_v1 = vld [vmem:[%s847_s1] sm:$0xf]  ;;  %v63_v4 = vpack.c.bf16 %v62_v2, %v62_v2  ;;  %v607_v5 = vld [vmem:[%s849_s3 + $0x38] sm:$0xff]   ;;  %vm72_vm2 = vcmask 64512   ;;  %v608_v6 = vld [vmem:[%s849_s3 + $0x30] sm:$0xff]   ;;  %vm468_vm3 = vcmask 15360  }
  0x1b   :  { %541 = vmatprep.subr.bf16.mxu1 %v681_v0  ;;  %557 = vmatprep.mubr.msk.bf16.mxu1 %vm682_vm0, %v681_v0  ;;  %v78_v3 = vsel %vm76_vm1, %v64_v1, 0  ;;  %v609_v7 = vld [vmem:[%s849_s3 + $0x28] sm:$0xff]   ;;  %v610_v8 = vld [vmem:[%s849_s3 + $0x20] sm:$0xff]   ;;  %v611_v9 = vld [vmem:[%s849_s3 + $0x18] sm:$0xff]  }
  0x1c   :  { %536 = vmatpush3.bf16.msra.mxu0 %v78_v3  ;;  %542 = vmatpush3.bf16.msra.mxu1 %v607_v5  ;;  %v612_v10 = vld [vmem:[%s849_s3 + $0x10] sm:$0xff]   ;;  %v613_v11 = vld [vmem:[%s849_s3 + $0x8] sm:$0xff]   ;;  %v614_v12 = vld [vmem:[%s849_s3] sm:$0xff]  }
  0x1d   :  { %561 = vmatprep.subr.bf16.mxu0 %v681_v0  ;;  %543 = vmatprep.subr.bf16.mxu1 %v681_v0  ;;  %v615_v13 = vld [vmem:[#allocation4 + $0x38] sm:$0xff]   ;;  %v616_v14 = vld [vmem:[#allocation4 + $0x30] sm:$0xff]   ;;  %v617_v15 = vld [vmem:[#allocation4 + $0x28] sm:$0xff]  }
  0x1e   :  { %v618_v16 = vld [vmem:[#allocation4 + $0x20] sm:$0xff]   ;;  %v619_v17 = vld [vmem:[#allocation4 + $0x18] sm:$0xff]   ;;  %v620_v18 = vld [vmem:[#allocation4 + $0x10] sm:$0xff]  }
  0x1f   :  { %538 = vmatmul.mubr.msk.bf16.vlgmr.msra.gmra.mxu0 %vm72_vm2, %v63_v4  ;;  %v476_v19 = vld [vmem:[%s848_s2] ss:$0 sm:$0xff]  ;;  %v621_v27 = vld [vmem:[#allocation4 + $0x8] sm:$0xff]   ;;  %v622_v28 = vld [vmem:[#allocation4] sm:$0xff]  }
  0x20   :  { %577 = vmatprep.mubr.msk.bf16.mxu0 %vm682_vm0, %v681_v0  ;;  %544 = vmatpush3.bf16.msra.mxu1 %v608_v6  ;;  %v623_v29 = vld [vmem:[%s853_s7 + $0x38] sm:$0xff]   ;;  %v624_v30 = vld [vmem:[%s853_s7 + $0x30] sm:$0xff]   ;;  %v625_v31 = vld [vmem:[%s853_s7 + $0x28] sm:$0xff]  }
  0x21   :  { %545 = vmatprep.subr.bf16.mxu1 %v681_v0  ;;  %562 = vmatpush3.bf16.msra.mxu0 %v615_v13  ;;  %v626_v32 = vld [vmem:[%s853_s7 + $0x20] sm:$0xff]   ;;  %v627_v33 = vld [vmem:[%s853_s7 + $0x18] sm:$0xff]   ;;  %v628_v34 = vld [vmem:[%s853_s7 + $0x10] sm:$0xff]  }
  0x22   :  { %563 = vmatprep.subr.bf16.mxu0 %v681_v0  ;;  %v478_v35 = vld [vmem:[%s850_s4] ss:$0 sm:$0xff]  ;;  %v629_v43 = vld [vmem:[%s853_s7 + $0x8] sm:$0xff]  }
  0x23   :  { %v630_v44 = vld [vmem:[%s853_s7] sm:$0xff]  }
  0x24   :  { %546 = vmatpush3.bf16.msra.mxu1 %v609_v7  ;;  %v487_v45 = vld [vmem:[%s852_s6] ss:$0 sm:$0xff] }
  0x25   :  { %547 = vmatprep.subr.bf16.mxu1 %v681_v0  ;;  %564 = vmatpush3.bf16.msra.mxu0 %v616_v14  ;;  %v496_v53 = vld [vmem:[%s854_s8] ss:$0 sm:$0xff] }
  0x26   :  { %565 = vmatprep.subr.bf16.mxu0 %v681_v0  ;;  %v505_v59 = vld [vmem:[%s855_s9] ss:$0 sm:$0xff] }
  0x28   :  { %548 = vmatpush3.bf16.msra.mxu1 %v610_v8 }
  0x29   :  { %549 = vmatprep.subr.bf16.mxu1 %v681_v0  ;;  %566 = vmatpush3.bf16.msra.mxu0 %v617_v15 }
  0x2a   :  { %567 = vmatprep.subr.bf16.mxu0 %v681_v0 }
  0x2c   :  { %550 = vmatpush3.bf16.msra.mxu1 %v611_v9 }
  0x2d   :  { %551 = vmatprep.subr.bf16.mxu1 %v681_v0  ;;  %568 = vmatpush3.bf16.msra.mxu0 %v618_v16 }
  0x2e   :  { %569 = vmatprep.subr.bf16.mxu0 %v681_v0 }
  0x30   :  { %552 = vmatpush3.bf16.msra.mxu1 %v612_v10 }
  0x31   :  { %553 = vmatprep.subr.bf16.mxu1 %v681_v0  ;;  %570 = vmatpush3.bf16.msra.mxu0 %v619_v17 }
  0x32   :  { %571 = vmatprep.subr.bf16.mxu0 %v681_v0 }
  0x34   :  { %554 = vmatpush3.bf16.msra.mxu1 %v613_v11 }
  0x35   :  { %555 = vmatprep.subr.bf16.mxu1 %v681_v0  ;;  %572 = vmatpush3.bf16.msra.mxu0 %v620_v18 }
  0x36   :  { %573 = vmatprep.subr.bf16.mxu0 %v681_v0 }
  0x38   :  { %556 = vmatpush3.bf16.msra.mxu1 %v614_v12 }
  0x39   :  { %581 = vmatprep.subr.bf16.mxu1 %v681_v0  ;;  %574 = vmatpush3.bf16.msra.mxu0 %v621_v27 }
  0x3a   :  { %575 = vmatprep.subr.bf16.mxu0 %v681_v0 }
  0x3d   :  { %576 = vmatpush3.bf16.msra.mxu0 %v622_v28 }
  0xdf   :  { %v114_v20 = vpop.f32.mrf.mxu0 }
  0xe0   :  { %v115_v21 = vadd.f32 %v476_v19, %v114_v20 }
  0xe1   :  { %v539_v22 = vpop.f32.mrf.mxu0 }
  0xe2   :  { %v120_v23 = vmax.f32 %v115_v21, 0.0 }
  0xe3   :  { %v117_v24 = vpop.f32.mrf.mxu0 }
  0xe4   :  { %v121_v25 = vpack.c.bf16 %v120_v23, %v120_v23 }
  0xe5   :  { %v540_v26 = vpop.f32.mrf.mxu0 }
  0xe6   :  { %558 = vmatmul.mubr.bf16.vlgmr.msra.gmra.mxu1 %v121_v25 }
  0xe7   :  { %597 = vmatprep.mubr.msk.bf16.mxu1 %vm682_vm0, %v681_v0  ;;  %582 = vmatpush3.bf16.msra.mxu1 %v623_v29 }
  0xe8   :  { %583 = vmatprep.subr.bf16.mxu1 %v681_v0 }
  0xeb   :  { %584 = vmatpush3.bf16.msra.mxu1 %v624_v30 }
  0xec   :  { %585 = vmatprep.subr.bf16.mxu1 %v681_v0 }
  0xef   :  { %586 = vmatpush3.bf16.msra.mxu1 %v625_v31 }
  0xf0   :  { %587 = vmatprep.subr.bf16.mxu1 %v681_v0 }
  0xf3   :  { %588 = vmatpush3.bf16.msra.mxu1 %v626_v32 }
  0xf4   :  { %589 = vmatprep.subr.bf16.mxu1 %v681_v0 }
  0xf7   :  { %590 = vmatpush3.bf16.msra.mxu1 %v627_v33 }
  0xf8   :  { %591 = vmatprep.subr.bf16.mxu1 %v681_v0 }
  0xfb   :  { %592 = vmatpush3.bf16.msra.mxu1 %v628_v34 }
  0xfc   :  { %593 = vmatprep.subr.bf16.mxu1 %v681_v0 }
  0xff   :  { %594 = vmatpush3.bf16.msra.mxu1 %v629_v43 }
 0x100   :  { %595 = vmatprep.subr.bf16.mxu1 %v681_v0 }
 0x103   :  { %596 = vmatpush3.bf16.msra.mxu1 %v630_v44 }
 0x1a6   :  { %v227_v36 = vpop.f32.mrf.mxu1 }
 0x1a7   :  { %v228_v37 = vadd.f32 %v478_v35, %v227_v36 }
 0x1a8   :  { %v559_v38 = vpop.f32.mrf.mxu1 }
 0x1a9   :  { %v233_v39 = vmax.f32 %v228_v37, 0.0 }
 0x1aa   :  { %v230_v40 = vpop.f32.mrf.mxu1 }
 0x1ab   :  { %v234_v41 = vpack.c.bf16 %v233_v39, %v233_v39 }
 0x1ac   :  { %v560_v42 = vpop.f32.mrf.mxu1 }
 0x1ad   :  { %578 = vmatmul.mubr.bf16.vlgmr.msra.gmra.mxu0 %v234_v41 }
 0x26d   :  { %v340_v46 = vpop.f32.mrf.mxu0 }
 0x26e   :  { %v341_v47 = vadd.f32 %v487_v45, %v340_v46 }
 0x26f   :  { %v579_v48 = vpop.f32.mrf.mxu0 }
 0x270   :  { %v346_v49 = vmax.f32 %v341_v47, 0.0 }
 0x271   :  { %v343_v50 = vpop.f32.mrf.mxu0 }
 0x272   :  { %v347_v51 = vpack.c.bf16 %v346_v49, %v346_v49 }
 0x273   :  { %v580_v52 = vpop.f32.mrf.mxu0 }
 0x274   :  { %598 = vmatmul.mubr.bf16.vlgmr.msra.gmra.mxu1 %v347_v51 }
 0x334   :  { %v453_v54 = vpop.f32.mrf.mxu1 }
 0x335   :  { %v454_v55 = vadd.f32 %v496_v53, %v453_v54 }
 0x336   :  { %v599_v56 = vpop.f32.mrf.mxu1 }
 0x337   :  { %631 = vtanh.f32 %v454_v55 }
 0x338   :  { %v456_v57 = vpop.f32.mrf.mxu1 }
 0x33a   :  { %v600_v58 = vpop.f32.mrf.mxu1 }
 0x344   :  { %v632_v60 = vpop.eup %631 }
 0x345   :  { %v467_v61 = vmul.f32 %v632_v60, %v505_v59 }
 0x347   :  { %469 = vst.msk [vmem:[%s856_s10] sm:$0xff] %vm468_vm3, %v467_v61 }
 0x348   :  { %474 = vsyncpa [#allocation3], 1 }
 0x349   :  { %475 = vsyncpa [#allocation5], 1 }

</bundles_post_ra>
